<compile_context>
chip_gen: v5e
topology: v5e:2x2
jax: 0.10.0
libtpu: 0.0.40
codegen_flags: <defaults>
</compile_context>

<pallas_src>
import jax
import jax.numpy as jnp
from jax.experimental import pallas as pl
from jax.experimental.pallas import tpu as pltpu


def _round_up(n: int, m: int) -> int:
    return ((n + m - 1) // m) * m


def qnet_kernel(x_ref, w1_ref, b1_ref, w2_ref, b2_ref, w3_ref, b3_ref, o_ref):
    """One batch tile: fc1 -> tanh -> fc2 -> tanh -> fc3, all VMEM-resident.

    x / weights are bf16 (MXU inputs); matmul accumulation and bias adds are
    f32; tanh runs in bf16 (its result feeds a bf16 MXU dot anyway).
    """
    x = x_ref[...]                                                  # (tm, S) bf16
    h1 = jnp.dot(x, w1_ref[...], preferred_element_type=jnp.float32)
    h1 = jnp.tanh((h1 + b1_ref[...]).astype(jnp.bfloat16))          # bf16 EUP tanh
    h2 = jnp.dot(h1, w2_ref[...], preferred_element_type=jnp.float32)
    h2 = jnp.tanh((h2 + b2_ref[...]).astype(jnp.bfloat16))
    q = jnp.dot(h2, w3_ref[...], preferred_element_type=jnp.float32) + b3_ref[...]
    o_ref[...] = q.astype(o_ref.dtype)                               # (tm, A_p)


def prepare_params(w1, b1, w2, b2, w3, b3):
    """One-time pad/cast of the weights (hoisted out of the per-call path).

    w*: (in, out) f32, b*: (1, out) f32. Only the *output* feature dims are
    lane-padded to 128 (w1's input dim stays = state_size so x needs no lane
    padding). Padded rows/cols are exact zeros, so padded lanes never leak
    into the un-padded output slice.
    """
    S, H1 = w1.shape
    H2 = w2.shape[1]
    A = w3.shape[1]
    H1p, H2p, Ap = (_round_up(d, 128) for d in (H1, H2, A))

    def pad_to(a, rows, cols, dtype):
        return jnp.pad(a, ((0, rows - a.shape[0]),
                           (0, cols - a.shape[1]))).astype(dtype)

    return (pad_to(w1, S, H1p, jnp.bfloat16),
            pad_to(b1, 1, H1p, jnp.float32),
            pad_to(w2, H1p, H2p, jnp.bfloat16),
            pad_to(b2, 1, H2p, jnp.float32),
            pad_to(w3, H2p, Ap, jnp.bfloat16),
            pad_to(b3, 1, Ap, jnp.float32))


def qnetwork_forward(x, w1p, b1p, w2p, b2p, w3p, b3p, *, action_size,
                     block_batch=512, out_dtype=jnp.bfloat16):
    """Pallas forward on pre-padded params. x: (B, S) f32/bf16 -> (B, A) out_dtype.

    Wrap the call site in jax.jit so the small batch pad/cast and the final
    slice fuse with the pallas_call.
    """
    B, S = x.shape
    assert w1p.shape[0] == S, "w1 must be pre-padded with prepare_params()"
    H1p = w1p.shape[1]
    H2p = w2p.shape[1]
    Ap = w3p.shape[1]

    # Batch tile: multiple of 16 (bf16 sublane-safe); at most half the batch so
    # real batches give >= 2 grid steps (lets v7x's two TCs split the batch),
    # capped at block_batch so huge batches keep >= ~512-row tiles.
    half = _round_up(max(1, (B + 1) // 2), 16)
    tm = min(_round_up(block_batch, 16), max(16, half))
    B_p = _round_up(B, tm)
    grid_m = B_p // tm

    xp = x if B_p == B else jnp.pad(x, ((0, B_p - B), (0, 0)))
    xp = xp.astype(jnp.bfloat16)

    def resident(shape):  # same block every grid step -> stays in VMEM
        return pl.BlockSpec(shape, lambda i: (0, 0))

    # Advisory cost + explicit VMEM budget (every spec gets 2 buffers).
    flops = 2 * B_p * (S * H1p + H1p * H2p + H2p * Ap)
    bytes_accessed = (
        2 * (xp.size + w1p.size + w2p.size + w3p.size)     # bf16 x / weights
        + 4 * (b1p.size + b2p.size + b3p.size)             # f32 biases
        + jnp.dtype(out_dtype).itemsize * B_p * Ap         # output
    )
    cost = pl.CostEstimate(flops=int(flops),
                           transcendentals=int(B_p * (H1p + H2p)),
                           bytes_accessed=int(bytes_accessed))
    footprint = 2 * (tm * S * 2 + tm * Ap * jnp.dtype(out_dtype).itemsize
                     + 2 * (w1p.size + w2p.size + w3p.size)
                     + 4 * (b1p.size + b2p.size + b3p.size))
    vmem_limit = int(min(64 << 20, max(4 << 20, 2 * footprint)))

    out_padded = pl.pallas_call(
        qnet_kernel,
        out_shape=jax.ShapeDtypeStruct((B_p, Ap), out_dtype),
        grid=(grid_m,),
        in_specs=[
            pl.BlockSpec((tm, S), lambda i: (i, 0)),   # x: tiled over batch, K = S
            resident((S, H1p)), resident((1, H1p)),
            resident((H1p, H2p)), resident((1, H2p)),
            resident((H2p, Ap)), resident((1, Ap)),
        ],
        out_specs=pl.BlockSpec((tm, Ap), lambda i: (i, 0)),
        compiler_params=pltpu.CompilerParams(
            dimension_semantics=("parallel",),          # 2-TC batch split on v7x
            vmem_limit_bytes=vmem_limit),
        cost_estimate=cost,
    )(xp, w1p, b1p, w2p, b2p, w3p, b3p)

    return out_padded[:B, :action_size]


def init_params(key, state_size, action_size, hidden_size):
    """Deterministic init mimicking PyTorch Linear default U(-k, k), k=1/sqrt(fan_in).
    Weights are stored transposed: (in, out); biases: (1, out)."""
    ks = jax.random.split(key, 6)

    def linear(kw, kb, fan_in, fan_out):
        bound = 1.0 / jnp.sqrt(fan_in)
        w = jax.random.uniform(kw, (fan_in, fan_out), jnp.float32, -bound, bound)
        b = jax.random.uniform(kb, (1, fan_out), jnp.float32, -bound, bound)
        return w, b

    w1, b1 = linear(ks[0], ks[1], state_size, hidden_size)
    w2, b2 = linear(ks[2], ks[3], hidden_size, hidden_size)
    w3, b3 = linear(ks[4], ks[5], hidden_size, action_size)
    return w1, b1, w2, b2, w3, b3


if __name__ == "__main__":
    # Small shapes consistent with QNetwork(state_size, action_size, hidden_size).
    batch = 8
    state_size = 16
    action_size = 4
    hidden_size = 32

    key = jax.random.PRNGKey(0)
    k_x, k_p = jax.random.split(key)
    x = jax.random.normal(k_x, (batch, state_size), jnp.float32)
    params = init_params(k_p, state_size, action_size, hidden_size)

    # One-time pad/cast of the weights, then a jitted forward closure.
    padded = prepare_params(*params)
    qnet = jax.jit(
        lambda s: qnetwork_forward(s, *padded, action_size=action_size))

    q = qnet(x)
    q = jax.block_until_ready(q)
    assert q.shape == (batch, action_size)

    # Full f32 reference (PyTorch semantics); tolerance covers bf16 MXU inputs
    # and the bf16 output stream.
    w1, b1, w2, b2, w3, b3 = params
    h1 = jnp.tanh(x @ w1 + b1)
    h2 = jnp.tanh(h1 @ w2 + b2)
    ref_f32 = h2 @ w3 + b3
    assert jnp.allclose(q.astype(jnp.float32), ref_f32, atol=5e-2, rtol=5e-2)

    print("KERNEL_OK")
</pallas_src>

<mosaic_0001>
module attributes {stable_mosaic.version = 11 : i64} {
  func.func @qnet_kernel(%arg0: i32, %arg1: memref<16x16xbf16, #tpu.memory_space<vmem>>, %arg2: memref<16x128xbf16, #tpu.memory_space<vmem>>, %arg3: memref<1x128xf32, #tpu.memory_space<vmem>>, %arg4: memref<128x128xbf16, #tpu.memory_space<vmem>>, %arg5: memref<1x128xf32, #tpu.memory_space<vmem>>, %arg6: memref<128x128xbf16, #tpu.memory_space<vmem>>, %arg7: memref<1x128xf32, #tpu.memory_space<vmem>>, %arg8: memref<16x128xbf16, #tpu.memory_space<vmem>>) attributes {dimension_semantics = [#tpu.dimension_semantics<parallel>], iteration_bounds = array<i64: 1>, scalar_prefetch = 0 : i64, scratch_operands = 0 : i64, tpu.core_type = #tpu.core_type<tc>, window_params = [{transform_indices = @transform_0, window_bounds = array<i64: 16, 16>}, {pipeline_mode = #tpu.pipeline_mode<synchronous>, transform_indices = @transform_1, window_bounds = array<i64: 16, 128>}, {pipeline_mode = #tpu.pipeline_mode<synchronous>, transform_indices = @transform_2, window_bounds = array<i64: 1, 128>}, {pipeline_mode = #tpu.pipeline_mode<synchronous>, transform_indices = @transform_3, window_bounds = array<i64: 128, 128>}, {pipeline_mode = #tpu.pipeline_mode<synchronous>, transform_indices = @transform_4, window_bounds = array<i64: 1, 128>}, {pipeline_mode = #tpu.pipeline_mode<synchronous>, transform_indices = @transform_5, window_bounds = array<i64: 128, 128>}, {pipeline_mode = #tpu.pipeline_mode<synchronous>, transform_indices = @transform_6, window_bounds = array<i64: 1, 128>}, {transform_indices = @transform_7, window_bounds = array<i64: 16, 128>}]} {
    %c0 = arith.constant 0 : index
    %c0_0 = arith.constant 0 : index
    %0 = vector.load %arg1[%c0, %c0_0] : memref<16x16xbf16, #tpu.memory_space<vmem>>, vector<16x16xbf16>
    %c0_1 = arith.constant 0 : index
    %c0_2 = arith.constant 0 : index
    %1 = vector.load %arg2[%c0_1, %c0_2] : memref<16x128xbf16, #tpu.memory_space<vmem>>, vector<16x128xbf16>
    %cst = arith.constant dense<0.000000e+00> : vector<16x128xf32>
    %2 = tpu.matmul %0, %1, %cst {dimension_numbers = #tpu.dot_dimension_numbers<[1], [0], [0], [1], [0, 0, 1, 1], [], []>} : vector<16x16xbf16>, vector<16x128xbf16>, vector<16x128xf32> -> vector<16x128xf32>
    %c0_3 = arith.constant 0 : index
    %c0_4 = arith.constant 0 : index
    %3 = vector.load %arg3[%c0_3, %c0_4] : memref<1x128xf32, #tpu.memory_space<vmem>>, vector<1x128xf32>
    %4 = vector.broadcast %3 : vector<1x128xf32> to vector<16x128xf32>
    %5 = arith.addf %2, %4 : vector<16x128xf32>
    %6 = arith.truncf %5 : vector<16x128xf32> to vector<16x128xbf16>
    %7 = math.tanh %6 : vector<16x128xbf16>
    %c0_5 = arith.constant 0 : index
    %c0_6 = arith.constant 0 : index
    %8 = vector.load %arg4[%c0_5, %c0_6] : memref<128x128xbf16, #tpu.memory_space<vmem>>, vector<128x128xbf16>
    %cst_7 = arith.constant dense<0.000000e+00> : vector<16x128xf32>
    %9 = tpu.matmul %7, %8, %cst_7 {dimension_numbers = #tpu.dot_dimension_numbers<[1], [0], [0], [1], [0, 0, 1, 1], [], []>} : vector<16x128xbf16>, vector<128x128xbf16>, vector<16x128xf32> -> vector<16x128xf32>
    %c0_8 = arith.constant 0 : index
    %c0_9 = arith.constant 0 : index
    %10 = vector.load %arg5[%c0_8, %c0_9] : memref<1x128xf32, #tpu.memory_space<vmem>>, vector<1x128xf32>
    %11 = vector.broadcast %10 : vector<1x128xf32> to vector<16x128xf32>
    %12 = arith.addf %9, %11 : vector<16x128xf32>
    %13 = arith.truncf %12 : vector<16x128xf32> to vector<16x128xbf16>
    %14 = math.tanh %13 : vector<16x128xbf16>
    %c0_10 = arith.constant 0 : index
    %c0_11 = arith.constant 0 : index
    %15 = vector.load %arg6[%c0_10, %c0_11] : memref<128x128xbf16, #tpu.memory_space<vmem>>, vector<128x128xbf16>
    %cst_12 = arith.constant dense<0.000000e+00> : vector<16x128xf32>
    %16 = tpu.matmul %14, %15, %cst_12 {dimension_numbers = #tpu.dot_dimension_numbers<[1], [0], [0], [1], [0, 0, 1, 1], [], []>} : vector<16x128xbf16>, vector<128x128xbf16>, vector<16x128xf32> -> vector<16x128xf32>
    %c0_13 = arith.constant 0 : index
    %c0_14 = arith.constant 0 : index
    %17 = vector.load %arg7[%c0_13, %c0_14] : memref<1x128xf32, #tpu.memory_space<vmem>>, vector<1x128xf32>
    %18 = vector.broadcast %17 : vector<1x128xf32> to vector<16x128xf32>
    %19 = arith.addf %16, %18 : vector<16x128xf32>
    %20 = arith.truncf %19 : vector<16x128xf32> to vector<16x128xbf16>
    %c0_15 = arith.constant 0 : index
    %c0_16 = arith.constant 0 : index
    %21 = vector.load %arg8[%c0_15, %c0_16] : memref<16x128xbf16, #tpu.memory_space<vmem>>, vector<16x128xbf16>
    tpu.vector_store %arg8[%c0_15, %c0_16], %20 {strides = array<i32>} : memref<16x128xbf16, #tpu.memory_space<vmem>>, vector<16x128xbf16>,
    return
  }
  func.func @transform_0(%arg0: i32) -> (i32, i32) {
    %c0_i32 = arith.constant 0 : i32
    %c0_i32_0 = arith.constant 0 : i32
    return %arg0, %c0_i32 : i32, i32
  }
  func.func @transform_1(%arg0: i32) -> (i32, i32) {
    %c0_i32 = arith.constant 0 : i32
    %c0_i32_0 = arith.constant 0 : i32
    %c0_i32_1 = arith.constant 0 : i32
    return %c0_i32, %c0_i32_0 : i32, i32
  }
  func.func @transform_2(%arg0: i32) -> (i32, i32) {
    %c0_i32 = arith.constant 0 : i32
    %c0_i32_0 = arith.constant 0 : i32
    %c0_i32_1 = arith.constant 0 : i32
    return %c0_i32, %c0_i32_0 : i32, i32
  }
  func.func @transform_3(%arg0: i32) -> (i32, i32) {
    %c0_i32 = arith.constant 0 : i32
    %c0_i32_0 = arith.constant 0 : i32
    %c0_i32_1 = arith.constant 0 : i32
    return %c0_i32, %c0_i32_0 : i32, i32
  }
  func.func @transform_4(%arg0: i32) -> (i32, i32) {
    %c0_i32 = arith.constant 0 : i32
    %c0_i32_0 = arith.constant 0 : i32
    %c0_i32_1 = arith.constant 0 : i32
    return %c0_i32, %c0_i32_0 : i32, i32
  }
  func.func @transform_5(%arg0: i32) -> (i32, i32) {
    %c0_i32 = arith.constant 0 : i32
    %c0_i32_0 = arith.constant 0 : i32
    %c0_i32_1 = arith.constant 0 : i32
    return %c0_i32, %c0_i32_0 : i32, i32
  }
  func.func @transform_6(%arg0: i32) -> (i32, i32) {
    %c0_i32 = arith.constant 0 : i32
    %c0_i32_0 = arith.constant 0 : i32
    %c0_i32_1 = arith.constant 0 : i32
    return %c0_i32, %c0_i32_0 : i32, i32
  }
  func.func @transform_7(%arg0: i32) -> (i32, i32) {
    %c0_i32 = arith.constant 0 : i32
    %c0_i32_0 = arith.constant 0 : i32
    return %arg0, %c0_i32 : i32, i32
  }
}

</mosaic_0001>

<bundles_post_ra>
// kernel: _lambda_.1
= control target key start
LH: loop header
LB: loop body
LE: loop exit
PB: predicated region body
PF: predicated region fallthrough
CT: control target
= control target key end

     0   :  { %12 = vsyncpa [#allocation3], 0  ;;  %s513_s0 = inlined_call_operand.vmem [shape: bf16[16,16], index: 0, kind: input, shape index: {}]   ;;  %s514_s1 = inlined_call_operand.vmem [shape: bf16[16,128], index: 1, kind: input, shape index: {}]   ;;  %s515_s2 = inlined_call_operand.vmem [shape: f32[1,128], index: 2, kind: input, shape index: {}]   ;;  %s516_s3 = inlined_call_operand.hbm [shape: bf16[128,128], index: 3, kind: input, shape index: {}]   ;;  %s517_s4 = inlined_call_operand.vmem [shape: f32[1,128], index: 4, kind: input, shape index: {}]   ;;  %s518_s5 = inlined_call_operand.hbm [shape: bf16[128,128], index: 5, kind: input, shape index: {}]   ;;  %s519_s6 = inlined_call_operand.vmem [shape: f32[1,128], index: 6, kind: input, shape index: {}]   ;;  %s520_s7 = inlined_call_operand.vmem [shape: bf16[16,128], index: 7, kind: output, shape index: {}]  }
   0x1   :  { %s24_s26 = sshll.u32 %s516_s3, 4  ;;  %s25_s26 = int_to_ptr.hbm [resolvable:$true] %s24_s26 }
   0x2   :  { %13 = vsyncpa [#allocation5], 0  ;;  %s445_s27 = smov [#allocation2]   ;;  %s39_s8 = sshll.u32 %s518_s5, 4  ;;  %s40_s8 = int_to_ptr.hbm [resolvable:$true] %s39_s8 }
   0x3   :  { %s26_s28 = sshll.u32 %s445_s27, 4  ;;  %s446_s9 = smov 64   ;;  %s27_s28 = int_to_ptr.vmem [resolvable:$true] %s26_s28 }
   0x4   :  { %s447_s10 = smov 4   ;;  %s448_s11 = smov [#allocation4]  }
   0x5   :  { %32 = dma.hbm_to_vmem [thread:$0]  %s25_s26, 1024, %s27_s28, [#allocation3], %s446_s9, %s446_s9, %s447_s10  }
   0x6   :  { %s41_s12 = sshll.u32 %s448_s11, 4  ;;  %s42_s12 = int_to_ptr.vmem [resolvable:$true] %s41_s12 }
   0x7   :  { %47 = dma.hbm_to_vmem [thread:$0]  %s40_s8, 1024, %s42_s12, [#allocation5], %s446_s9, %s446_s9, %s447_s10  }
   0x8   :  { %441 = dma.done.wait [#allocation3], 1024  }
   0x9   :  { %442 = vsyncadd [#allocation3], 4294966272 }
   0xa   :  { %443 = dma.done.wait [#allocation5], 1024  }
   0xb   :  { %444 = vsyncadd [#allocation5], 4294966272  ;;  %v356_v0 = vld [vmem:[%s514_s1] sm:$0xff]  ;;  %v364_v1 = vld [vmem:[#allocation2 + $0x38] sm:$0xff]  ;;  %vm78_vm0 = vcmask 130048  }
   0xc   :  { %v355_v2 = vld [vmem:[%s513_s0] sm:$0xff]  ;;  %89 = vmatpush.bf16.msra.mxu0 %v356_v0  ;;  %170 = vmatpush.bf16.msra.mxu1 %v364_v1  ;;  %v363_v3 = vld [vmem:[#allocation2 + $0x30] sm:$0xff]  ;;  %v362_v4 = vld [vmem:[#allocation2 + $0x28] sm:$0xff] }
   0xd   :  { %v361_v5 = vld [vmem:[#allocation2 + $0x20] sm:$0xff]  ;;  %v360_v6 = vld [vmem:[#allocation2 + $0x18] sm:$0xff]  ;;  %v359_v7 = vld [vmem:[#allocation2 + $0x10] sm:$0xff] }
   0xe   :  { %v358_v8 = vld [vmem:[#allocation2 + $0x8] sm:$0xff]  ;;  %v357_v9 = vld [vmem:[#allocation2] sm:$0xff]  ;;  %v372_v10 = vld [vmem:[#allocation4 + $0x38] sm:$0xff] }
   0xf   :  { %290 = vmatmul.msk.bf16.vlgmr.msra.gmra.mxu0 %vm78_vm0, %v355_v2  ;;  %258 = vmatpush.bf16.msra.mxu2 %v372_v10  ;;  %v371_v11 = vld [vmem:[#allocation4 + $0x30] sm:$0xff]  ;;  %v382_v13 = vld [vmem:[%s515_s2] ss:$0 sm:$0xff]  ;;  %v370_v23 = vld [vmem:[#allocation4 + $0x28] sm:$0xff] }
  0x10   :  { %171 = vmatpush.bf16.msra.mxu1 %v363_v3  ;;  %v369_v24 = vld [vmem:[#allocation4 + $0x20] sm:$0xff]  ;;  %v368_v25 = vld [vmem:[#allocation4 + $0x18] sm:$0xff]  ;;  %v367_v26 = vld [vmem:[#allocation4 + $0x10] sm:$0xff] }
  0x11   :  { %v366_v27 = vld [vmem:[#allocation4 + $0x8] sm:$0xff]  ;;  %v365_v28 = vld [vmem:[#allocation4] sm:$0xff] }
  0x12   :  { %v383_v30 = vld [vmem:[%s517_s4] ss:$0 sm:$0xff] }
  0x13   :  { %259 = vmatpush.bf16.msra.mxu2 %v371_v11  ;;  %v384_v41 = vld [vmem:[%s519_s6] ss:$0 sm:$0xff] }
  0x14   :  { %172 = vmatpush.bf16.msra.mxu1 %v362_v4 }
  0x17   :  { %260 = vmatpush.bf16.msra.mxu2 %v370_v23 }
  0x18   :  { %173 = vmatpush.bf16.msra.mxu1 %v361_v5 }
  0x1b   :  { %261 = vmatpush.bf16.msra.mxu2 %v369_v24 }
  0x1c   :  { %174 = vmatpush.bf16.msra.mxu1 %v360_v6 }
  0x1f   :  { %262 = vmatpush.bf16.msra.mxu2 %v368_v25 }
  0x20   :  { %175 = vmatpush.bf16.msra.mxu1 %v359_v7 }
  0x23   :  { %263 = vmatpush.bf16.msra.mxu2 %v367_v26 }
  0x24   :  { %176 = vmatpush.bf16.msra.mxu1 %v358_v8 }
  0x27   :  { %264 = vmatpush.bf16.msra.mxu2 %v366_v27 }
  0x28   :  { %177 = vmatpush.bf16.msra.mxu1 %v357_v9 }
  0x2b   :  { %265 = vmatpush.bf16.msra.mxu2 %v365_v28 }
  0x8c   :  { %v91_v12 = vpop.f32.mrf.mxu0 }
  0x8d   :  { %v92_v15 = vadd.f32 %v382_v13, %v91_v12 }
  0x94   :  { %v93_v14 = vpop.f32.mrf.mxu0 }
  0x95   :  { %v94_v16 = vadd.f32 %v382_v13, %v93_v14 }
  0x97   :  { %v96_v17 = vpack.c.bf16 %v94_v16, %v92_v15 }
  0x99   :  { %v97_v18 = vunpack.c.l.bf16 %v96_v17  ;;  %v98_v19 = vunpack.c.h.bf16 %v96_v17 }
  0x9b   :  { %385 = vtanh.f32 %v97_v18 }
  0x9c   :  { %387 = vtanh.f32 %v98_v19 }
  0xa1   :  { %v386_v20 = vpop.eup %385 }
  0xa2   :  { %v388_v21 = vpop.eup %387 }
  0xa3   :  { %v101_v22 = vpack.c.bf16 %v388_v21, %v386_v20 }
  0xa5   :  { %178 = vmatmul.bf16.vlgmr.msra.gmra.mxu1 %v101_v22 }
 0x122   :  { %v179_v29 = vpop.f32.mrf.mxu1 }
 0x123   :  { %v180_v32 = vadd.f32 %v383_v30, %v179_v29 }
 0x12a   :  { %v181_v31 = vpop.f32.mrf.mxu1 }
 0x12b   :  { %v182_v33 = vadd.f32 %v383_v30, %v181_v31 }
 0x12d   :  { %v184_v34 = vpack.c.bf16 %v182_v33, %v180_v32 }
 0x12f   :  { %v185_v35 = vunpack.c.l.bf16 %v184_v34  ;;  %v186_v36 = vunpack.c.h.bf16 %v184_v34 }
 0x131   :  { %389 = vtanh.f32 %v185_v35 }
 0x132   :  { %391 = vtanh.f32 %v186_v36 }
 0x137   :  { %v390_v37 = vpop.eup %389 }
 0x138   :  { %v392_v38 = vpop.eup %391 }
 0x139   :  { %v189_v39 = vpack.c.bf16 %v392_v38, %v390_v37 }
 0x13b   :  { %266 = vmatmul.bf16.vlgmr.msra.gmra.mxu2 %v189_v39 }
 0x1be   :  { %v267_v40 = vpop.f32.mrf.mxu2 }
 0x1bf   :  { %v268_v43 = vadd.f32 %v384_v41, %v267_v40 }
 0x1c6   :  { %v269_v42 = vpop.f32.mrf.mxu2 }
 0x1c7   :  { %v270_v44 = vadd.f32 %v384_v41, %v269_v42 }
 0x1c9   :  { %v376_v45 = vpack.c.bf16 %v270_v44, %v268_v43 }
 0x1cb   :  { %377 = vst [vmem:[%s520_s7] sm:$0xff] %v376_v45  }
 0x1cc   :  { %280 = vsyncpa [#allocation3], 1 }
 0x1cd   :  { %281 = vsyncpa [#allocation5], 1 }

</bundles_post_ra>
